<compile_context>
chip_gen: v7x
topology: tpu7x:2x2x1
jax: 0.10.0
libtpu: 0.0.40
codegen_flags: <defaults>
</compile_context>

<pallas_src>
import jax
import jax.numpy as jnp
from jax.experimental import pallas as pl
from jax.experimental.pallas import tpu as pltpu


_MAX_BATCH_TILE = 256   # rows per grid step once the batch gets large


def _round_up(n, m):
    return (n + m - 1) // m * m


def _nhits_kernel(x_ref,
                  w1_ref, b1_ref,
                  w2_ref, b2_ref,
                  w3_ref, b3_ref,
                  wh_ref, bh_ref,
                  out_ref):
    bf16 = jnp.bfloat16
    x = x_ref[...]                                                     # bf16 tile

    # fc stack: Linear -> ReLU, three times (bf16 MXU inputs, f32 accumulate,
    # f32 bias-add / ReLU on the VPU).
    h = jnp.dot(x, w1_ref[...], preferred_element_type=jnp.float32) + b1_ref[...]
    h = jnp.maximum(h, 0.0)
    h = jnp.dot(h.astype(bf16), w2_ref[...],
                preferred_element_type=jnp.float32) + b2_ref[...]
    h = jnp.maximum(h, 0.0)
    h = jnp.dot(h.astype(bf16), w3_ref[...],
                preferred_element_type=jnp.float32) + b3_ref[...]
    h = jnp.maximum(h, 0.0)

    # fused [backcast | forecast | pad] head -> single lane-dense output slab.
    out = jnp.dot(h.astype(bf16), wh_ref[...],
                  preferred_element_type=jnp.float32) + bh_ref[...]
    out_ref[...] = out.astype(out_ref.dtype)


def nhits_block_forward(x, params):
    """NHITSBlock forward.  x: [B, input_size] float32.

    Returns (backcast [B, input_size] f32, forecast [B, output_size] f32)."""
    (w1, b1, w2, b2, w3, b3, wb, bb, wf, bf) = params
    B, in_size = x.shape
    hidden = w1.shape[1]
    out_size = wf.shape[1]

    # ---- fuse the two heads; pad the fused output dim up to 128 lanes ----
    head_cols = in_size + out_size
    P = _round_up(head_cols, 128)
    w_head = jnp.zeros((hidden, P), jnp.float32)
    w_head = w_head.at[:, :in_size].set(wb).at[:, in_size:head_cols].set(wf)
    b_head = jnp.zeros((1, P), jnp.float32)
    b_head = b_head.at[:, :in_size].set(bb).at[:, in_size:head_cols].set(bf)

    # ---- batch tiling: one fat grid step for small B, 256-row tiles else ----
    Bp = _round_up(B, 8)
    if Bp <= _MAX_BATCH_TILE:
        batch_tile = Bp
    else:
        batch_tile = _MAX_BATCH_TILE
        Bp = _round_up(B, batch_tile)
    if Bp != B:
        x = jnp.pad(x, ((0, Bp - B), (0, 0)))
    grid = (Bp // batch_tile,)

    # ---- bf16 matmul operands; biases stay f32 ----
    bf16 = jnp.bfloat16
    x_bf = x.astype(bf16)
    w1b, w2b, w3b, whb = (w.astype(bf16) for w in (w1, w2, w3, w_head))

    def const_spec(shape):
        # Whole-array block, identical block index for every grid step.
        # (Further opt for long grids: pipeline_mode=pl.Buffered(1) to skip
        #  double-buffering the constant weights.)
        return pl.BlockSpec(shape, lambda i: (0, 0))

    in_specs = [
        pl.BlockSpec((batch_tile, in_size), lambda i: (i, 0)),   # x tile
        const_spec(w1b.shape), const_spec(b1.shape),
        const_spec(w2b.shape), const_spec(b2.shape),
        const_spec(w3b.shape), const_spec(b3.shape),
        const_spec(whb.shape), const_spec(b_head.shape),
    ]
    out_specs = pl.BlockSpec((batch_tile, P), lambda i: (i, 0))
    out_shape = jax.ShapeDtypeStruct((Bp, P), jnp.float32)

    fused = pl.pallas_call(
        _nhits_kernel,
        grid=grid,
        in_specs=in_specs,
        out_specs=out_specs,
        out_shape=out_shape,
        compiler_params=pltpu.CompilerParams(
            dimension_semantics=("parallel",)),
    )(x_bf, w1b, b1, w2b, b2, w3b, b3, whb, b_head)

    backcast = fused[:B, :in_size]
    forecast = fused[:B, in_size:head_cols]
    return backcast, forecast


def init_params(key, input_size, output_size, hidden_size):
    """Deterministic synthetic parameters (PyTorch layout transposed to (in,out))."""
    ks = jax.random.split(key, 10)

    def linear(kw, kb, fan_in, fan_out):
        bound = 1.0 / jnp.sqrt(fan_in)
        w = jax.random.uniform(kw, (fan_in, fan_out), jnp.float32, -bound, bound)
        b = jax.random.uniform(kb, (1, fan_out), jnp.float32, -bound, bound)
        return w, b

    w1, b1 = linear(ks[0], ks[1], input_size, hidden_size)
    w2, b2 = linear(ks[2], ks[3], hidden_size, hidden_size)
    w3, b3 = linear(ks[4], ks[5], hidden_size, hidden_size)
    wb, bb = linear(ks[6], ks[7], hidden_size, input_size)
    wf, bf = linear(ks[8], ks[9], hidden_size, output_size)
    return (w1, b1, w2, b2, w3, b3, wb, bb, wf, bf)


def reference_forward(x, params):
    """Pure-JAX f32 reference (matches the PyTorch module)."""
    (w1, b1, w2, b2, w3, b3, wb, bb, wf, bf) = params
    h = jax.nn.relu(x @ w1 + b1)
    h = jax.nn.relu(h @ w2 + b2)
    h = jax.nn.relu(h @ w3 + b3)
    return h @ wb + bb, h @ wf + bf


if __name__ == "__main__":
    input_size = 64    # lookback window length
    output_size = 32   # forecast horizon
    hidden_size = 128
    batch = 16

    key = jax.random.PRNGKey(0)
    k_x, k_p = jax.random.split(key)
    x = jax.random.normal(k_x, (batch, input_size), jnp.float32)
    params = init_params(k_p, input_size, output_size, hidden_size)

    backcast, forecast = nhits_block_forward(x, params)
    jax.block_until_ready((backcast, forecast))

    ref_back, ref_fore = reference_forward(x, params)
    assert backcast.shape == (batch, input_size)
    assert forecast.shape == (batch, output_size)
    # bf16 matmul inputs (f32 accumulation) -> loosened tolerance vs f32 ref.
    assert jnp.allclose(backcast, ref_back, atol=3e-2, rtol=3e-2)
    assert jnp.allclose(forecast, ref_fore, atol=3e-2, rtol=3e-2)

    print("KERNEL_OK")
</pallas_src>

<mosaic_0001>
module attributes {stable_mosaic.version = 11 : i64} {
  func.func @_nhits_kernel(%arg0: i32, %arg1: memref<16x64xbf16, #tpu.memory_space<vmem>>, %arg2: memref<64x128xbf16, #tpu.memory_space<vmem>>, %arg3: memref<1x128xf32, #tpu.memory_space<vmem>>, %arg4: memref<128x128xbf16, #tpu.memory_space<vmem>>, %arg5: memref<1x128xf32, #tpu.memory_space<vmem>>, %arg6: memref<128x128xbf16, #tpu.memory_space<vmem>>, %arg7: memref<1x128xf32, #tpu.memory_space<vmem>>, %arg8: memref<128x128xbf16, #tpu.memory_space<vmem>>, %arg9: memref<1x128xf32, #tpu.memory_space<vmem>>, %arg10: memref<16x128xf32, #tpu.memory_space<vmem>>) attributes {dimension_semantics = [#tpu.dimension_semantics<parallel>], iteration_bounds = array<i64: 1>, scalar_prefetch = 0 : i64, scratch_operands = 0 : i64, tpu.core_type = #tpu.core_type<tc>, window_params = [{transform_indices = @transform_0, window_bounds = array<i64: 16, 64>}, {pipeline_mode = #tpu.pipeline_mode<synchronous>, transform_indices = @transform_1, window_bounds = array<i64: 64, 128>}, {pipeline_mode = #tpu.pipeline_mode<synchronous>, transform_indices = @transform_2, window_bounds = array<i64: 1, 128>}, {pipeline_mode = #tpu.pipeline_mode<synchronous>, transform_indices = @transform_3, window_bounds = array<i64: 128, 128>}, {pipeline_mode = #tpu.pipeline_mode<synchronous>, transform_indices = @transform_4, window_bounds = array<i64: 1, 128>}, {pipeline_mode = #tpu.pipeline_mode<synchronous>, transform_indices = @transform_5, window_bounds = array<i64: 128, 128>}, {pipeline_mode = #tpu.pipeline_mode<synchronous>, transform_indices = @transform_6, window_bounds = array<i64: 1, 128>}, {pipeline_mode = #tpu.pipeline_mode<synchronous>, transform_indices = @transform_7, window_bounds = array<i64: 128, 128>}, {pipeline_mode = #tpu.pipeline_mode<synchronous>, transform_indices = @transform_8, window_bounds = array<i64: 1, 128>}, {transform_indices = @transform_9, window_bounds = array<i64: 16, 128>}]} {
    %c0 = arith.constant 0 : index
    %c0_0 = arith.constant 0 : index
    %0 = vector.load %arg1[%c0, %c0_0] : memref<16x64xbf16, #tpu.memory_space<vmem>>, vector<16x64xbf16>
    %c0_1 = arith.constant 0 : index
    %c0_2 = arith.constant 0 : index
    %1 = vector.load %arg2[%c0_1, %c0_2] : memref<64x128xbf16, #tpu.memory_space<vmem>>, vector<64x128xbf16>
    %cst = arith.constant dense<0.000000e+00> : vector<16x128xf32>
    %2 = tpu.matmul %0, %1, %cst {dimension_numbers = #tpu.dot_dimension_numbers<[1], [0], [0], [1], [0, 0, 1, 1], [], []>} : vector<16x64xbf16>, vector<64x128xbf16>, vector<16x128xf32> -> vector<16x128xf32>
    %c0_3 = arith.constant 0 : index
    %c0_4 = arith.constant 0 : index
    %3 = vector.load %arg3[%c0_3, %c0_4] : memref<1x128xf32, #tpu.memory_space<vmem>>, vector<1x128xf32>
    %4 = vector.broadcast %3 : vector<1x128xf32> to vector<16x128xf32>
    %5 = arith.addf %2, %4 : vector<16x128xf32>
    %cst_5 = arith.constant 0.000000e+00 : f32
    %6 = vector.broadcast %cst_5 : f32 to vector<16x128xf32>
    %7 = arith.maximumf %5, %6 : vector<16x128xf32>
    %8 = arith.truncf %7 : vector<16x128xf32> to vector<16x128xbf16>
    %c0_6 = arith.constant 0 : index
    %c0_7 = arith.constant 0 : index
    %9 = vector.load %arg4[%c0_6, %c0_7] : memref<128x128xbf16, #tpu.memory_space<vmem>>, vector<128x128xbf16>
    %cst_8 = arith.constant dense<0.000000e+00> : vector<16x128xf32>
    %10 = tpu.matmul %8, %9, %cst_8 {dimension_numbers = #tpu.dot_dimension_numbers<[1], [0], [0], [1], [0, 0, 1, 1], [], []>} : vector<16x128xbf16>, vector<128x128xbf16>, vector<16x128xf32> -> vector<16x128xf32>
    %c0_9 = arith.constant 0 : index
    %c0_10 = arith.constant 0 : index
    %11 = vector.load %arg5[%c0_9, %c0_10] : memref<1x128xf32, #tpu.memory_space<vmem>>, vector<1x128xf32>
    %12 = vector.broadcast %11 : vector<1x128xf32> to vector<16x128xf32>
    %13 = arith.addf %10, %12 : vector<16x128xf32>
    %cst_11 = arith.constant 0.000000e+00 : f32
    %14 = vector.broadcast %cst_11 : f32 to vector<16x128xf32>
    %15 = arith.maximumf %13, %14 : vector<16x128xf32>
    %16 = arith.truncf %15 : vector<16x128xf32> to vector<16x128xbf16>
    %c0_12 = arith.constant 0 : index
    %c0_13 = arith.constant 0 : index
    %17 = vector.load %arg6[%c0_12, %c0_13] : memref<128x128xbf16, #tpu.memory_space<vmem>>, vector<128x128xbf16>
    %cst_14 = arith.constant dense<0.000000e+00> : vector<16x128xf32>
    %18 = tpu.matmul %16, %17, %cst_14 {dimension_numbers = #tpu.dot_dimension_numbers<[1], [0], [0], [1], [0, 0, 1, 1], [], []>} : vector<16x128xbf16>, vector<128x128xbf16>, vector<16x128xf32> -> vector<16x128xf32>
    %c0_15 = arith.constant 0 : index
    %c0_16 = arith.constant 0 : index
    %19 = vector.load %arg7[%c0_15, %c0_16] : memref<1x128xf32, #tpu.memory_space<vmem>>, vector<1x128xf32>
    %20 = vector.broadcast %19 : vector<1x128xf32> to vector<16x128xf32>
    %21 = arith.addf %18, %20 : vector<16x128xf32>
    %cst_17 = arith.constant 0.000000e+00 : f32
    %22 = vector.broadcast %cst_17 : f32 to vector<16x128xf32>
    %23 = arith.maximumf %21, %22 : vector<16x128xf32>
    %24 = arith.truncf %23 : vector<16x128xf32> to vector<16x128xbf16>
    %c0_18 = arith.constant 0 : index
    %c0_19 = arith.constant 0 : index
    %25 = vector.load %arg8[%c0_18, %c0_19] : memref<128x128xbf16, #tpu.memory_space<vmem>>, vector<128x128xbf16>
    %cst_20 = arith.constant dense<0.000000e+00> : vector<16x128xf32>
    %26 = tpu.matmul %24, %25, %cst_20 {dimension_numbers = #tpu.dot_dimension_numbers<[1], [0], [0], [1], [0, 0, 1, 1], [], []>} : vector<16x128xbf16>, vector<128x128xbf16>, vector<16x128xf32> -> vector<16x128xf32>
    %c0_21 = arith.constant 0 : index
    %c0_22 = arith.constant 0 : index
    %27 = vector.load %arg9[%c0_21, %c0_22] : memref<1x128xf32, #tpu.memory_space<vmem>>, vector<1x128xf32>
    %28 = vector.broadcast %27 : vector<1x128xf32> to vector<16x128xf32>
    %29 = arith.addf %26, %28 : vector<16x128xf32>
    %c0_23 = arith.constant 0 : index
    %c0_24 = arith.constant 0 : index
    %30 = vector.load %arg10[%c0_23, %c0_24] : memref<16x128xf32, #tpu.memory_space<vmem>>, vector<16x128xf32>
    tpu.vector_store %arg10[%c0_23, %c0_24], %29 {strides = array<i32>} : memref<16x128xf32, #tpu.memory_space<vmem>>, vector<16x128xf32>,
    return
  }
  func.func @transform_0(%arg0: i32) -> (i32, i32) {
    %c0_i32 = arith.constant 0 : i32
    %c0_i32_0 = arith.constant 0 : i32
    return %arg0, %c0_i32 : i32, i32
  }
  func.func @transform_1(%arg0: i32) -> (i32, i32) {
    %c0_i32 = arith.constant 0 : i32
    %c0_i32_0 = arith.constant 0 : i32
    %c0_i32_1 = arith.constant 0 : i32
    return %c0_i32, %c0_i32_0 : i32, i32
  }
  func.func @transform_2(%arg0: i32) -> (i32, i32) {
    %c0_i32 = arith.constant 0 : i32
    %c0_i32_0 = arith.constant 0 : i32
    %c0_i32_1 = arith.constant 0 : i32
    return %c0_i32, %c0_i32_0 : i32, i32
  }
  func.func @transform_3(%arg0: i32) -> (i32, i32) {
    %c0_i32 = arith.constant 0 : i32
    %c0_i32_0 = arith.constant 0 : i32
    %c0_i32_1 = arith.constant 0 : i32
    return %c0_i32, %c0_i32_0 : i32, i32
  }
  func.func @transform_4(%arg0: i32) -> (i32, i32) {
    %c0_i32 = arith.constant 0 : i32
    %c0_i32_0 = arith.constant 0 : i32
    %c0_i32_1 = arith.constant 0 : i32
    return %c0_i32, %c0_i32_0 : i32, i32
  }
  func.func @transform_5(%arg0: i32) -> (i32, i32) {
    %c0_i32 = arith.constant 0 : i32
    %c0_i32_0 = arith.constant 0 : i32
    %c0_i32_1 = arith.constant 0 : i32
    return %c0_i32, %c0_i32_0 : i32, i32
  }
  func.func @transform_6(%arg0: i32) -> (i32, i32) {
    %c0_i32 = arith.constant 0 : i32
    %c0_i32_0 = arith.constant 0 : i32
    %c0_i32_1 = arith.constant 0 : i32
    return %c0_i32, %c0_i32_0 : i32, i32
  }
  func.func @transform_7(%arg0: i32) -> (i32, i32) {
    %c0_i32 = arith.constant 0 : i32
    %c0_i32_0 = arith.constant 0 : i32
    %c0_i32_1 = arith.constant 0 : i32
    return %c0_i32, %c0_i32_0 : i32, i32
  }
  func.func @transform_8(%arg0: i32) -> (i32, i32) {
    %c0_i32 = arith.constant 0 : i32
    %c0_i32_0 = arith.constant 0 : i32
    %c0_i32_1 = arith.constant 0 : i32
    return %c0_i32, %c0_i32_0 : i32, i32
  }
  func.func @transform_9(%arg0: i32) -> (i32, i32) {
    %c0_i32 = arith.constant 0 : i32
    %c0_i32_0 = arith.constant 0 : i32
    return %arg0, %c0_i32 : i32, i32
  }
}

</mosaic_0001>

<bundles_post_ra>
// kernel: tpu_custom_call.1
= control target key start
LH: loop header
LB: loop body
LE: loop exit
PB: predicated region body
PF: predicated region fallthrough
CT: control target
= control target key end

     0   :  { %14 = vsyncpa [#allocation3], 0  ;;  %s1089_s0 = inlined_call_operand.hbm [shape: bf16[16,64], index: 0, kind: input, shape index: {}]   ;;  %s1090_s1 = inlined_call_operand.hbm [shape: bf16[64,128], index: 1, kind: input, shape index: {}]   ;;  %s1091_s2 = inlined_call_operand.vmem [shape: f32[1,128], index: 2, kind: input, shape index: {}]   ;;  %s1092_s3 = inlined_call_operand.hbm [shape: bf16[128,128], index: 3, kind: input, shape index: {}]   ;;  %s1093_s4 = inlined_call_operand.vmem [shape: f32[1,128], index: 4, kind: input, shape index: {}]   ;;  %s1094_s5 = inlined_call_operand.hbm [shape: bf16[128,128], index: 5, kind: input, shape index: {}]   ;;  %s1095_s6 = inlined_call_operand.vmem [shape: f32[1,128], index: 6, kind: input, shape index: {}]   ;;  %s1096_s7 = inlined_call_operand.hbm [shape: bf16[128,128], index: 7, kind: input, shape index: {}]   ;;  %s1097_s8 = inlined_call_operand.vmem [shape: f32[1,128], index: 8, kind: input, shape index: {}]   ;;  %s1098_s9 = inlined_call_operand.hbm [shape: f32[16,128], index: 9, kind: output, shape index: {}]  }
   0x1   :  { %15 = vsyncpa [#allocation6], 0 }
   0x2   :  { %16 = vsyncpa [#allocation9], 0 }
   0x3   :  { %17 = vsyncpa [#allocation4], 0  ;;  %s878_s30 = smov [#allocation5]   ;;  %s879_s11 = smov [#allocation8]  }
   0x4   :  { %s35_s10 = sshll.u32 %s878_s30, 4  ;;  %s63_s12 = sshll.u32 %s879_s11, 4  ;;  %s36_s10 = int_to_ptr.vmem [resolvable:$true] %s35_s10  ;;  %s940_s12 = int_to_ptr.vmem [resolvable:$true] %s63_s12 }
   0x5   :  { %s738_s15 = scalar_lea.hbm %s1090_s1, 512 }
   0x6   :  { %p739_p0 = scmp.ne.s32.totalorder %s1090_s1, %s738_s15  ;;  %p742_p1 = scmp.lt.u32.totalorder %s738_s15, %s1090_s1 }
   0x8   :  { %p744_p2 = pnand %p742_p1, %p739_p0 }
   0xa   :  { %747 = shalt.err (!%p744_p2)
}
   0xb   :  { %s748_s20 = scalar_lea.vmem %s36_s10, 512  ;;  %p753_p4 = scmp.lt.s32.totalorder %s36_s10, %s36_s10 }
   0xc   :  { %p749_p3 = scmp.ne.s32.totalorder %s36_s10, %s748_s20  ;;  %p754_p5 = scmp.lt.s32.totalorder %s748_s20, %s748_s20 }
   0xe   :  { %p755_p6 = por %p754_p5, %p753_p4 }
  0x10   :  { %p756_p7 = pnand %p755_p6, %p749_p3 }
  0x12   :  { %759 = shalt.err (!%p756_p7)
}
  0x13   :  { %s880_s21 = smov 64   ;;  %s881_s22 = smov 4  }
  0x14   :  { %41 = dma.hbm_to_vmem [thread:$0]  %s1090_s1, 512, %s36_s10, [#allocation6], %s880_s21, %s880_s21, %s881_s22  }
  0x15   :  { %s760_s27 = scalar_lea.hbm %s1094_s5, 1024 }
  0x16   :  { %p761_p8 = scmp.ne.s32.totalorder %s1094_s5, %s760_s27  ;;  %p764_p9 = scmp.lt.u32.totalorder %s760_s27, %s1094_s5 }
  0x18   :  { %p766_p10 = pnand %p764_p9, %p761_p8 }
  0x1a   :  { %769 = shalt.err (!%p766_p10)
}
  0x1b   :  { %s770_s13 = scalar_lea.vmem %s940_s12, 1024  ;;  %p775_p12 = scmp.lt.s32.totalorder %s940_s12, %s940_s12 }
  0x1c   :  { %p771_p11 = scmp.ne.s32.totalorder %s940_s12, %s770_s13  ;;  %p776_p13 = scmp.lt.s32.totalorder %s770_s13, %s770_s13 }
  0x1e   :  { %p777_p0 = por %p776_p13, %p775_p12 }
  0x20   :  { %p778_p1 = pnand %p777_p0, %p771_p11 }
  0x22   :  { %781 = shalt.err (!%p778_p1)
}
  0x23   :  { %69 = dma.hbm_to_vmem [thread:$0]  %s1094_s5, 1024, %s940_s12, [#allocation9], %s880_s21, %s880_s21, %s881_s22  }
  0x24   :  { %s882_s14 = smov [#allocation2]   ;;  %s883_s16 = smov [#allocation7]  }
  0x25   :  { %s23_s15 = sshll.u32 %s882_s14, 4  ;;  %s49_s17 = sshll.u32 %s883_s16, 4  ;;  %s24_s15 = int_to_ptr.vmem [resolvable:$true] %s23_s15  ;;  %s977_s17 = int_to_ptr.vmem [resolvable:$true] %s49_s17 }
  0x26   :  { %s782_s20 = scalar_lea.hbm %s1089_s0, 128 }
  0x27   :  { %p783_p2 = scmp.ne.s32.totalorder %s1089_s0, %s782_s20  ;;  %p786_p3 = scmp.lt.u32.totalorder %s782_s20, %s1089_s0 }
  0x29   :  { %p788_p4 = pnand %p786_p3, %p783_p2 }
  0x2b   :  { %791 = shalt.err (!%p788_p4)
}
  0x2c   :  { %s792_s5 = scalar_lea.vmem %s24_s15, 128  ;;  %p797_p6 = scmp.lt.s32.totalorder %s24_s15, %s24_s15 }
  0x2d   :  { %p793_p5 = scmp.ne.s32.totalorder %s24_s15, %s792_s5  ;;  %p798_p7 = scmp.lt.s32.totalorder %s792_s5, %s792_s5 }
  0x2f   :  { %p799_p8 = por %p798_p7, %p797_p6 }
  0x31   :  { %p800_p9 = pnand %p799_p8, %p793_p5 }
  0x33   :  { %803 = shalt.err (!%p800_p9)
}
  0x34   :  { %29 = dma.hbm_to_vmem [thread:$0]  %s1089_s0, 128, %s24_s15, [#allocation3], %s880_s21, %s880_s21, %s881_s22  }
  0x35   :  { %s804_s30 = scalar_lea.hbm %s1092_s3, 1024 }
  0x36   :  { %p805_p10 = scmp.ne.s32.totalorder %s1092_s3, %s804_s30  ;;  %p808_p11 = scmp.lt.u32.totalorder %s804_s30, %s1092_s3 }
  0x38   :  { %p810_p12 = pnand %p808_p11, %p805_p10 }
  0x3a   :  { %813 = shalt.err (!%p810_p12)
}
  0x3b   :  { %s814_s14 = scalar_lea.vmem %s977_s17, 1024  ;;  %p819_p0 = scmp.lt.s32.totalorder %s977_s17, %s977_s17 }
  0x3c   :  { %p815_p13 = scmp.ne.s32.totalorder %s977_s17, %s814_s14  ;;  %p820_p1 = scmp.lt.s32.totalorder %s814_s14, %s814_s14 }
  0x3e   :  { %p821_p2 = por %p820_p1, %p819_p0 }
  0x40   :  { %p822_p3 = pnand %p821_p2, %p815_p13 }
  0x42   :  { %825 = shalt.err (!%p822_p3)
}
  0x43   :  { %55 = dma.hbm_to_vmem [thread:$0]  %s1092_s3, 1024, %s977_s17, [#allocation6], %s880_s21, %s880_s21, %s881_s22  }
  0x44   :  { %s884_s16 = smov [#allocation10]   ;;  %s826_s23 = scalar_lea.hbm %s1096_s7, 1024 }
  0x45   :  { %s77_s18 = sshll.u32 %s884_s16, 4  ;;  %p827_p4 = scmp.ne.s32.totalorder %s1096_s7, %s826_s23  ;;  %s78_s18 = int_to_ptr.vmem [resolvable:$true] %s77_s18 }
  0x46   :  { %p830_p5 = scmp.lt.u32.totalorder %s826_s23, %s1096_s7 }
  0x48   :  { %p832_p6 = pnand %p830_p5, %p827_p4 }
  0x4a   :  { %835 = shalt.err (!%p832_p6)
}
  0x4b   :  { %s836_s12 = scalar_lea.vmem %s78_s18, 1024  ;;  %p841_p8 = scmp.lt.s32.totalorder %s78_s18, %s78_s18 }
  0x4c   :  { %p837_p7 = scmp.ne.s32.totalorder %s78_s18, %s836_s12  ;;  %p842_p9 = scmp.lt.s32.totalorder %s836_s12, %s836_s12 }
  0x4e   :  { %p843_p10 = por %p842_p9, %p841_p8 }
  0x50   :  { %p844_p11 = pnand %p843_p10, %p837_p7 }
  0x52   :  { %847 = shalt.err (!%p844_p11)
}
  0x53   :  { %83 = dma.hbm_to_vmem [thread:$0]  %s1096_s7, 1024, %s78_s18, [#allocation9], %s880_s21, %s880_s21, %s881_s22  }
  0x54   :  { %870 = dma.done.wait [#allocation3], 128  }
  0x55   :  { %871 = vsyncadd [#allocation3], 4294967168 }
  0x56   :  { %872 = dma.done.wait [#allocation6], 1536  }
  0x57   :  { %873 = vsyncadd [#allocation6], 4294965760 }
  0x58   :  { %874 = dma.done.wait [#allocation9], 2048  }
  0x59   :  { %875 = vsyncadd [#allocation9], 4294965248  ;;  %v885_v0 = vmov 0.0   ;;  %vm886_vm0 = vmmov 0   ;;  %v709_v1 = vld [vmem:[#allocation5] sm:$0xff]   ;;  %v710_v2 = vld [vmem:[#allocation5 + $0x8] sm:$0xff]  }
  0x5a   :  { %625 = vmatprep.subr.bf16.mxu0 %v885_v0  ;;  %633 = vmatprep.mubr.msk.bf16.mxu0 %vm886_vm0, %v885_v0  ;;  %v714_v3 = vld [vmem:[#allocation7] sm:$0xff]   ;;  %v711_v4 = vld [vmem:[#allocation5 + $0x10] sm:$0xff]   ;;  %v715_v5 = vld [vmem:[#allocation7 + $0x8] sm:$0xff]   ;;  %vm148_vm1 = vcmask 523264   ;;  %s887_s30 = smov [#allocation11]  }
  0x5b   :  { %637 = vmatprep.subr.bf16.mxu1 %v885_v0  ;;  %653 = vmatprep.mubr.msk.bf16.mxu1 %vm886_vm0, %v885_v0  ;;  %v712_v6 = vld [vmem:[#allocation5 + $0x18] sm:$0xff]   ;;  %v716_v8 = vld [vmem:[#allocation7 + $0x10] sm:$0xff]   ;;  %v718_v10 = vld [vmem:[#allocation7 + $0x20] sm:$0xff]   ;;  %s545_s11 = sshll.u32 %s887_s30, 4  ;;  %s546_s11 = int_to_ptr.vmem [resolvable:$true] %s545_s11 }
  0x5c   :  { %626 = vmatpush3.bf16.msra.mxu0 %v709_v1  ;;  %638 = vmatpush3.bf16.msra.mxu1 %v714_v3  ;;  %v713_v7 = vld [vmem:[#allocation2] sm:$0xff]   ;;  %v719_v11 = vld [vmem:[#allocation7 + $0x28] sm:$0xff]   ;;  %v720_v12 = vld [vmem:[#allocation7 + $0x30] sm:$0xff]   ;;  %p853_p13 = scmp.lt.s32.totalorder %s546_s11, %s546_s11 }
  0x5d   :  { %627 = vmatprep.subr.bf16.mxu0 %v885_v0  ;;  %639 = vmatprep.subr.bf16.mxu1 %v885_v0  ;;  %v717_v9 = vld [vmem:[#allocation7 + $0x18] sm:$0xff]   ;;  %v722_v14 = vld [vmem:[#allocation8] sm:$0xff]   ;;  %v723_v15 = vld [vmem:[#allocation8 + $0x8] sm:$0xff]  }
  0x5e   :  { %v721_v13 = vld [vmem:[#allocation7 + $0x38] sm:$0xff]   ;;  %v724_v16 = vld [vmem:[#allocation8 + $0x10] sm:$0xff]   ;;  %v726_v18 = vld [vmem:[#allocation8 + $0x20] sm:$0xff]  }
  0x5f   :  { %v725_v17 = vld [vmem:[#allocation8 + $0x18] sm:$0xff]   ;;  %v727_v19 = vld [vmem:[#allocation8 + $0x28] sm:$0xff]   ;;  %v728_v30 = vld [vmem:[#allocation8 + $0x30] sm:$0xff]  }
  0x60   :  { %628 = vmatpush3.bf16.msra.mxu0 %v710_v2  ;;  %640 = vmatpush3.bf16.msra.mxu1 %v715_v5  ;;  %v559_v20 = vld [vmem:[%s1091_s2] ss:$0 sm:$0xff]  ;;  %v730_v32 = vld [vmem:[#allocation10] sm:$0xff]   ;;  %v731_v33 = vld [vmem:[#allocation10 + $0x8] sm:$0xff]  }
  0x61   :  { %629 = vmatprep.subr.bf16.mxu0 %v885_v0  ;;  %641 = vmatprep.subr.bf16.mxu1 %v885_v0  ;;  %v729_v31 = vld [vmem:[#allocation8 + $0x38] sm:$0xff]   ;;  %v732_v34 = vld [vmem:[#allocation10 + $0x10] sm:$0xff]   ;;  %v734_v36 = vld [vmem:[#allocation10 + $0x20] sm:$0xff]  }
  0x62   :  { %v733_v35 = vld [vmem:[#allocation10 + $0x18] sm:$0xff]   ;;  %v735_v37 = vld [vmem:[#allocation10 + $0x28] sm:$0xff]   ;;  %v736_v48 = vld [vmem:[#allocation10 + $0x30] sm:$0xff]  }
  0x63   :  { %v566_v38 = vld [vmem:[%s1093_s4] ss:$0 sm:$0xff] }
  0x64   :  { %630 = vmatpush3.bf16.msra.mxu0 %v711_v4  ;;  %642 = vmatpush3.bf16.msra.mxu1 %v716_v8  ;;  %v737_v49 = vld [vmem:[#allocation10 + $0x38] sm:$0xff]  }
  0x65   :  { %631 = vmatprep.subr.bf16.mxu0 %v885_v0  ;;  %643 = vmatprep.subr.bf16.mxu1 %v885_v0  ;;  %v575_v50 = vld [vmem:[%s1095_s6] ss:$0 sm:$0xff]  ;;  %s848_s6 = scalar_lea.vmem %s546_s11, 256 }
  0x66   :  { %v584_v60 = vld [vmem:[%s1097_s8] ss:$0 sm:$0xff]  ;;  %p849_p12 = scmp.ne.s32.totalorder %s546_s11, %s848_s6  ;;  %p854_p0 = scmp.lt.s32.totalorder %s848_s6, %s848_s6 }
  0x68   :  { %632 = vmatpush3.bf16.msra.mxu0 %v712_v6  ;;  %644 = vmatpush3.bf16.msra.mxu1 %v717_v9  ;;  %p855_p1 = por %p854_p0, %p853_p13 }
  0x69   :  { %657 = vmatprep.subr.bf16.mxu0 %v885_v0  ;;  %645 = vmatprep.subr.bf16.mxu1 %v885_v0 }
  0x6a   :  { %p856_p2 = pnand %p855_p1, %p849_p12 }
  0x6b   :  { %634 = vmatmul.mubr.msk.bf16.vlgmr.msra.gmra.mrb[0].mxu0 %vm148_vm1, %v713_v7 }
  0x6c   :  { %673 = vmatprep.mubr.msk.bf16.mxu0 %vm886_vm0, %v885_v0  ;;  %646 = vmatpush3.bf16.msra.mxu1 %v718_v10 }
  0x6d   :  { %647 = vmatprep.subr.bf16.mxu1 %v885_v0  ;;  %658 = vmatpush3.bf16.msra.mxu0 %v722_v14 }
  0x6e   :  { %659 = vmatprep.subr.bf16.mxu0 %v885_v0 }
  0x70   :  { %648 = vmatpush3.bf16.msra.mxu1 %v719_v11 }
  0x71   :  { %649 = vmatprep.subr.bf16.mxu1 %v885_v0  ;;  %660 = vmatpush3.bf16.msra.mxu0 %v723_v15 }
  0x72   :  { %661 = vmatprep.subr.bf16.mxu0 %v885_v0 }
  0x74   :  { %650 = vmatpush3.bf16.msra.mxu1 %v720_v12 }
  0x75   :  { %651 = vmatprep.subr.bf16.mxu1 %v885_v0  ;;  %662 = vmatpush3.bf16.msra.mxu0 %v724_v16 }
  0x76   :  { %663 = vmatprep.subr.bf16.mxu0 %v885_v0 }
  0x78   :  { %652 = vmatpush3.bf16.msra.mxu1 %v721_v13 }
  0x79   :  { %677 = vmatprep.subr.bf16.mxu1 %v885_v0  ;;  %664 = vmatpush3.bf16.msra.mxu0 %v725_v17 }
  0x7a   :  { %665 = vmatprep.subr.bf16.mxu0 %v885_v0 }
  0x7d   :  { %666 = vmatpush3.bf16.msra.mxu0 %v726_v18 }
  0x7e   :  { %667 = vmatprep.subr.bf16.mxu0 %v885_v0 }
  0x81   :  { %668 = vmatpush3.bf16.msra.mxu0 %v727_v19 }
  0x82   :  { %669 = vmatprep.subr.bf16.mxu0 %v885_v0 }
  0x85   :  { %670 = vmatpush3.bf16.msra.mxu0 %v728_v30 }
  0x86   :  { %671 = vmatprep.subr.bf16.mxu0 %v885_v0 }
  0x89   :  { %672 = vmatpush3.bf16.msra.mxu0 %v729_v31 }
 0x13e   :  { %v186_v21 = vpop.f32.mrb[0].mxu0 }
 0x13f   :  { %v187_v22 = vadd.f32 %v559_v20, %v186_v21  ;;  %v635_v23 = vpop.f32.mrb[1].mxu0 }
 0x140   :  { %v189_v24 = vpop.f32.mrb[2].mxu0 }
 0x141   :  { %v190_v25 = vadd.f32 %v559_v20, %v189_v24  ;;  %v636_v26 = vpop.f32.mrb[3].mxu0  ;;  %v193_v27 = vmax.f32 %v187_v22, 0.0 }
 0x143   :  { %v194_v28 = vmax.f32 %v190_v25, 0.0 }
 0x145   :  { %v195_v29 = vpack.c.bf16 %v194_v28, %v193_v27 }
 0x147   :  { %654 = vmatmul.mubr.bf16.vlgmr.msra.gmra.mrb[0].mxu1 %v195_v29 }
 0x148   :  { %693 = vmatprep.mubr.msk.bf16.mxu1 %vm886_vm0, %v885_v0  ;;  %678 = vmatpush3.bf16.msra.mxu1 %v730_v32 }
 0x149   :  { %679 = vmatprep.subr.bf16.mxu1 %v885_v0 }
 0x14c   :  { %680 = vmatpush3.bf16.msra.mxu1 %v731_v33 }
 0x14d   :  { %681 = vmatprep.subr.bf16.mxu1 %v885_v0 }
 0x150   :  { %682 = vmatpush3.bf16.msra.mxu1 %v732_v34 }
 0x151   :  { %683 = vmatprep.subr.bf16.mxu1 %v885_v0 }
 0x154   :  { %684 = vmatpush3.bf16.msra.mxu1 %v733_v35 }
 0x155   :  { %685 = vmatprep.subr.bf16.mxu1 %v885_v0 }
 0x158   :  { %686 = vmatpush3.bf16.msra.mxu1 %v734_v36 }
 0x159   :  { %687 = vmatprep.subr.bf16.mxu1 %v885_v0 }
 0x15c   :  { %688 = vmatpush3.bf16.msra.mxu1 %v735_v37 }
 0x15d   :  { %689 = vmatprep.subr.bf16.mxu1 %v885_v0 }
 0x160   :  { %690 = vmatpush3.bf16.msra.mxu1 %v736_v48 }
 0x161   :  { %691 = vmatprep.subr.bf16.mxu1 %v885_v0 }
 0x164   :  { %692 = vmatpush3.bf16.msra.mxu1 %v737_v49 }
 0x21a   :  { %v301_v39 = vpop.f32.mrb[0].mxu1 }
 0x21b   :  { %v302_v40 = vadd.f32 %v566_v38, %v301_v39  ;;  %v655_v41 = vpop.f32.mrb[1].mxu1 }
 0x21c   :  { %v304_v42 = vpop.f32.mrb[2].mxu1 }
 0x21d   :  { %v305_v43 = vadd.f32 %v566_v38, %v304_v42  ;;  %v656_v44 = vpop.f32.mrb[3].mxu1  ;;  %v308_v45 = vmax.f32 %v302_v40, 0.0 }
 0x21f   :  { %v309_v46 = vmax.f32 %v305_v43, 0.0 }
 0x221   :  { %v310_v47 = vpack.c.bf16 %v309_v46, %v308_v45 }
 0x223   :  { %674 = vmatmul.mubr.bf16.vlgmr.msra.gmra.mrb[4].mxu0 %v310_v47 }
 0x2f6   :  { %v416_v51 = vpop.f32.mrb[4].mxu0 }
 0x2f7   :  { %v417_v52 = vadd.f32 %v575_v50, %v416_v51  ;;  %v675_v53 = vpop.f32.mrb[5].mxu0 }
 0x2f8   :  { %v419_v54 = vpop.f32.mrb[6].mxu0 }
 0x2f9   :  { %v420_v55 = vadd.f32 %v575_v50, %v419_v54  ;;  %v676_v56 = vpop.f32.mrb[7].mxu0  ;;  %v423_v57 = vmax.f32 %v417_v52, 0.0 }
 0x2fb   :  { %v424_v58 = vmax.f32 %v420_v55, 0.0 }
 0x2fd   :  { %v425_v59 = vpack.c.bf16 %v424_v58, %v423_v57 }
 0x2ff   :  { %694 = vmatmul.mubr.bf16.vlgmr.msra.gmra.mrb[4].mxu1 %v425_v59 }
 0x3d2   :  { %v531_v61 = vpop.f32.mrb[4].mxu1 }
 0x3d3   :  { %v532_v62 = vadd.f32 %v584_v60, %v531_v61  ;;  %v695_v63 = vpop.f32.mrb[5].mxu1 }
 0x3d4   :  { %v534_v0 = vpop.f32.mrb[6].mxu1 }
 0x3d5   :  { %538 = vst [vmem:[#allocation11] sm:$0xff] %v532_v62  ;;  %v535_v1 = vadd.f32 %v584_v60, %v534_v0  ;;  %v696_v2 = vpop.f32.mrb[7].mxu1 }
 0x3d7   :  { %539 = vst [vmem:[#allocation11 + $0x8] sm:$0xff] %v535_v1 }
 0x3d8   :  { %859 = shalt.err (!%p856_p2)
}
 0x3d9   :  { %s860_s1 = scalar_lea.hbm %s1098_s9, 256 }
 0x3da   :  { %p861_p3 = scmp.ne.s32.totalorder %s1098_s9, %s860_s1  ;;  %p864_p4 = scmp.lt.u32.totalorder %s860_s1, %s1098_s9 }
 0x3dc   :  { %p866_p5 = pnand %p864_p4, %p861_p3 }
 0x3de   :  { %869 = shalt.err (!%p866_p5)
}
 0x3df   :  { %s888_s16 = smov 128   ;;  %s889_s18 = smov 8  }
 0x3e0   :  { %551 = dma.vmem_to_hbm [thread:$0]  %s546_s11, 256, %s1098_s9, [#allocation4], %s888_s16, %s888_s16, %s889_s18  }
 0x3e1   :  { %876 = dma.done.wait [#allocation4], 256  }
 0x3e2   :  { %877 = vsyncadd [#allocation4], 4294967040 }
 0x3e3   :  { %555 = vsyncpa [#allocation3], 1 }
 0x3e4   :  { %556 = vsyncpa [#allocation6], 1 }
 0x3e5   :  { %557 = vsyncpa [#allocation9], 1 }
 0x3e6   :  { %558 = vsyncpa [#allocation4], 1 }

</bundles_post_ra>
